<compile_context>
chip_gen: v6e
topology: v6e:2x2x1
jax: 0.10.0
libtpu: 0.0.40
codegen_flags: <defaults>
</compile_context>

<pallas_src>
import functools

import jax
import jax.numpy as jnp
from jax.experimental import pallas as pl
from jax.experimental.pallas import tpu as pltpu

EPSILON = 1e-6


def _round_up(x: int, m: int) -> int:
    return (x + m - 1) // m * m


def _cdiv(a: int, b: int) -> int:
    return (a + b - 1) // b


def norm_kernel(gamma_ref, beta_ref, x_ref, o_ref, *, n_true: int):
    # x_ref block shape: (rows_tile, L). Every lane in the block is real data
    # (block last dim == full array dim), so no masking is needed for the sums.
    # Rows beyond the true row count (partial last block) compute garbage that
    # Pallas discards on store.
    x = x_ref[...].astype(jnp.float32)

    # Pass 1: mean.
    mean = jnp.sum(x, axis=-1, keepdims=True) * (1.0 / float(n_true))  # (rows_tile, 1)

    # Pass 2: centered sum of squares (VMEM re-read only; numerically stable).
    centered = x - mean
    denom = float(n_true - 1)  # unbiased, like torch.std; n_true==1 -> 0/0 = NaN (matches torch)
    var = jnp.sum(centered * centered, axis=-1, keepdims=True) / denom
    std = jnp.sqrt(var)

    gamma = gamma_ref[0]  # scalars from SMEM, read once per invocation
    beta = beta_ref[0]

    scale = gamma / (std + EPSILON)  # (rows_tile, 1), folded per-row scale

    # One mul + one add per element; single cast at the final store.
    o_ref[...] = (centered * scale + beta).astype(o_ref.dtype)


def pallas_norm(
    x,
    gamma,
    beta,
    *,
    target_block_bytes=2 * 1024 * 1024,
    vmem_limit_bytes=32 * 1024 * 1024,
    min_grid_steps=8,
):
    N, C, H, W = x.shape
    rows = N * C
    L = H * W

    itemsize = jnp.dtype(x.dtype).itemsize
    # Native sublane multiple per dtype width (f32: 8, bf16: 16, int8/fp8: 32).
    sublane = {1: 32, 2: 16, 4: 8}.get(itemsize, 8)

    # Row tile sized to ~target_block_bytes (amortizes the ~0.35 us per-step
    # overhead), but capped so the grid keeps >= min_grid_steps steps when the
    # row count allows it (v7x megacore + pipeline depth).
    rows_tile = max(sublane, target_block_bytes // max(L * itemsize, 1))
    steps_cap = max(_round_up(_cdiv(rows, min_grid_steps), sublane), sublane)
    rows_tile = _round_up(min(rows_tile, steps_cap), sublane)
    # TODO(synk): add an L-chunked path (second "arbitrary" grid axis with
    # (rows_tile, 1) VMEM accumulators) for huge H*W where even a sublane-high
    # block exceeds the VMEM budget.

    grid = (_cdiv(rows, rows_tile),)  # partial last block; no row padding

    x2 = x.reshape(rows, L)  # pure reshape: no pad, no extra HBM copy

    out2 = pl.pallas_call(
        functools.partial(norm_kernel, n_true=L),
        out_shape=jax.ShapeDtypeStruct((rows, L), x.dtype),
        grid_spec=pltpu.PrefetchScalarGridSpec(
            num_scalar_prefetch=0,
            grid=grid,
            in_specs=[
                pl.BlockSpec(memory_space=pltpu.MemorySpace.SMEM),  # gamma (1,)
                pl.BlockSpec(memory_space=pltpu.MemorySpace.SMEM),  # beta  (1,)
                pl.BlockSpec((rows_tile, L), lambda i: (i, 0)),
            ],
            out_specs=pl.BlockSpec((rows_tile, L), lambda i: (i, 0)),
        ),
        compiler_params=pltpu.CompilerParams(
            dimension_semantics=("parallel",),
            vmem_limit_bytes=vmem_limit_bytes,
        ),
    )(gamma, beta, x2)

    return out2.reshape(N, C, H, W)


def reference_norm(x, gamma, beta):
    xf = x.astype(jnp.float32)
    mean = jnp.mean(xf, axis=(-2, -1), keepdims=True)
    std = jnp.std(xf, axis=(-2, -1), keepdims=True, ddof=1)  # unbiased, like torch
    return (gamma * (xf - mean) / (std + EPSILON) + beta).astype(x.dtype)


if __name__ == "__main__":
    key = jax.random.PRNGKey(0)
    x = jax.random.normal(key, (2, 4, 16, 16), dtype=jnp.float32)

    # Deterministic parameter init matching the module's __init__:
    #   beta = ones(1), gamma = zeros(1)
    gamma = jnp.zeros((1,), dtype=jnp.float32)
    beta = jnp.ones((1,), dtype=jnp.float32)

    out = pallas_norm(x, gamma, beta)
    jax.block_until_ready(out)
    ref = reference_norm(x, gamma, beta)
    assert out.shape == x.shape and out.dtype == x.dtype
    assert jnp.allclose(out, ref, atol=1e-5, rtol=1e-5)

    # Non-trivial gamma/beta (default gamma=0 would mask normalization errors).
    gamma2 = jnp.full((1,), 0.7, dtype=jnp.float32)
    beta2 = jnp.full((1,), -0.3, dtype=jnp.float32)
    out2 = pallas_norm(x, gamma2, beta2)
    jax.block_until_ready(out2)
    ref2 = reference_norm(x, gamma2, beta2)
    assert jnp.allclose(out2, ref2, atol=1e-5, rtol=1e-5)

    # Ragged case: rows not a multiple of the sublane tile AND H*W not a
    # multiple of 128 -> exercises the partial-last-block / masked-lane path
    # that replaced the host-side padding.
    key3 = jax.random.PRNGKey(1)
    x3 = jax.random.normal(key3, (2, 5, 7, 9), dtype=jnp.float32) * 3.0 + 1.5
    out3 = pallas_norm(x3, gamma2, beta2)
    jax.block_until_ready(out3)
    ref3 = reference_norm(x3, gamma2, beta2)
    assert out3.shape == x3.shape
    assert jnp.allclose(out3, ref3, atol=1e-5, rtol=1e-5)

    print("KERNEL_OK")
</pallas_src>

<mosaic_0001>
module attributes {stable_mosaic.version = 11 : i64} {
  func.func @norm_kernel(%arg0: i32, %arg1: memref<1xf32, #tpu.memory_space<smem>>, %arg2: memref<1xf32, #tpu.memory_space<smem>>, %arg3: memref<8x256xf32, #tpu.memory_space<vmem>>, %arg4: memref<8x256xf32, #tpu.memory_space<vmem>>) attributes {dimension_semantics = [#tpu.dimension_semantics<parallel>], iteration_bounds = array<i64: 1>, scalar_prefetch = 0 : i64, scratch_operands = 0 : i64, tpu.core_type = #tpu.core_type<tc>, window_params = [{transform_indices = @transform_0, window_bounds = array<i64: 1>}, {transform_indices = @transform_1, window_bounds = array<i64: 1>}, {transform_indices = @transform_2, window_bounds = array<i64: 8, 256>}, {transform_indices = @transform_3, window_bounds = array<i64: 8, 256>}]} {
    %c0 = arith.constant 0 : index
    %c0_0 = arith.constant 0 : index
    %0 = vector.load %arg3[%c0, %c0_0] : memref<8x256xf32, #tpu.memory_space<vmem>>, vector<8x256xf32>
    %cst = arith.constant dense<0.000000e+00> : vector<8xf32>
    %1 = vector.multi_reduction <add>, %0, %cst [1] : vector<8x256xf32> to vector<8xf32>
    %2 = vector.shape_cast %1 : vector<8xf32> to vector<8x1xf32>
    %cst_1 = arith.constant 3.906250e-03 : f32
    %3 = vector.broadcast %cst_1 : f32 to vector<8x1xf32>
    %4 = arith.mulf %2, %3 : vector<8x1xf32>
    %5 = vector.broadcast %4 : vector<8x1xf32> to vector<8x256xf32>
    %6 = arith.subf %0, %5 : vector<8x256xf32>
    %7 = arith.mulf %6, %6 : vector<8x256xf32>
    %cst_2 = arith.constant dense<0.000000e+00> : vector<8xf32>
    %8 = vector.multi_reduction <add>, %7, %cst_2 [1] : vector<8x256xf32> to vector<8xf32>
    %9 = vector.shape_cast %8 : vector<8xf32> to vector<8x1xf32>
    %cst_3 = arith.constant 2.550000e+02 : f32
    %10 = vector.broadcast %cst_3 : f32 to vector<8x1xf32>
    %11 = arith.divf %9, %10 : vector<8x1xf32>
    %12 = math.sqrt %11 : vector<8x1xf32>
    %c0_4 = arith.constant 0 : index
    %13 = memref.load %arg1[%c0_4] : memref<1xf32, #tpu.memory_space<smem>>
    %c0_5 = arith.constant 0 : index
    %14 = memref.load %arg2[%c0_5] : memref<1xf32, #tpu.memory_space<smem>>
    %cst_6 = arith.constant 9.99999997E-7 : f32
    %15 = vector.broadcast %cst_6 : f32 to vector<8x1xf32>
    %16 = arith.addf %12, %15 : vector<8x1xf32>
    %17 = vector.broadcast %13 : f32 to vector<8x1xf32>
    %18 = arith.divf %17, %16 : vector<8x1xf32>
    %19 = vector.broadcast %18 : vector<8x1xf32> to vector<8x256xf32>
    %20 = arith.mulf %6, %19 : vector<8x256xf32>
    %21 = vector.broadcast %14 : f32 to vector<8x256xf32>
    %22 = arith.addf %20, %21 : vector<8x256xf32>
    %c0_7 = arith.constant 0 : index
    %c0_8 = arith.constant 0 : index
    %23 = vector.load %arg4[%c0_7, %c0_8] : memref<8x256xf32, #tpu.memory_space<vmem>>, vector<8x256xf32>
    tpu.vector_store %arg4[%c0_7, %c0_8], %22 {strides = array<i32>} : memref<8x256xf32, #tpu.memory_space<vmem>>, vector<8x256xf32>,
    return
  }
  func.func @transform_0(%arg0: i32) -> i32 {
    %c0_i32 = arith.constant 0 : i32
    %c0_i32_0 = arith.constant 0 : i32
    return %c0_i32 : i32
  }
  func.func @transform_1(%arg0: i32) -> i32 {
    %c0_i32 = arith.constant 0 : i32
    %c0_i32_0 = arith.constant 0 : i32
    return %c0_i32 : i32
  }
  func.func @transform_2(%arg0: i32) -> (i32, i32) {
    %c0_i32 = arith.constant 0 : i32
    %c0_i32_0 = arith.constant 0 : i32
    return %arg0, %c0_i32 : i32, i32
  }
  func.func @transform_3(%arg0: i32) -> (i32, i32) {
    %c0_i32 = arith.constant 0 : i32
    %c0_i32_0 = arith.constant 0 : i32
    return %arg0, %c0_i32 : i32, i32
  }
}

</mosaic_0001>

<bundles_post_ra>
// kernel: tpu_custom_call.1
= control target key start
LH: loop header
LB: loop body
LE: loop exit
PB: predicated region body
PF: predicated region fallthrough
CT: control target
= control target key end

     0   :  { %10 = vsyncpa [#allocation5], 0  ;;  %s163_s0 = inlined_call_operand.<no memory space> [shape: f32[1], index: 0, kind: input, shape index: {}]   ;;  %s164_s1 = inlined_call_operand.<no memory space> [shape: f32[1], index: 1, kind: input, shape index: {}]   ;;  %s165_s2 = inlined_call_operand.hbm [shape: f32[8,256], index: 2, kind: input, shape index: {}]   ;;  %s166_s3 = inlined_call_operand.hbm [shape: f32[8,256], index: 3, kind: output, shape index: {}]  }
   0x1   :  { %11 = vsyncpa [#allocation6], 0  ;;  %s129_s12 = smov [#allocation4]  }
   0x2   :  { %s22_s13 = sshll.u32 %s129_s12, 4  ;;  %s23_s13 = int_to_ptr.vmem [resolvable:$true] %s22_s13 }
   0x3   :  { %s93_s14 = scalar_lea.vmem %s23_s13, 256  ;;  %p98_p1 = scmp.lt.s32.totalorder %s23_s13, %s23_s13 }
   0x4   :  { %p94_p0 = scmp.ne.s32.totalorder %s23_s13, %s93_s14  ;;  %p99_p2 = scmp.lt.s32.totalorder %s93_s14, %s93_s14 }
   0x6   :  { %p100_p3 = por %p99_p2, %p98_p1 }
   0x8   :  { %p101_p4 = pnand %p100_p3, %p94_p0 }
   0xa   :  { %104 = shalt.err (!%p101_p4)
}
   0xb   :  { %25 = dma.hbm_to_vmem [thread:$0]  %s165_s2, 256, %s23_s13, [#allocation5]  }
   0xc   :  { %125 = dma.done.wait [#allocation5], 256  }
   0xd   :  { %126 = vsyncadd [#allocation5], 4294967040  ;;  %v29_v0 = vld [vmem:[#allocation4] sm:$0xff]  ;;  %v30_v1 = vld [vmem:[#allocation4 + $0x8] sm:$0xff]  ;;  %v54_v18 = vstv %s163_s0  ;;  %v59_v21 = vstv %s164_s1  ;;  %s130_s20 = smov [#allocation7]  }
   0xe   :  { %v31_v2 = vadd.f32 %v30_v1, %v29_v0  ;;  %s70_s21 = sshll.u32 %s130_s20, 4  ;;  %s71_s21 = int_to_ptr.vmem [resolvable:$true] %s70_s21 }
   0xf   :  { %s105_s22 = scalar_lea.vmem %s71_s21, 256  ;;  %p110_p6 = scmp.lt.s32.totalorder %s71_s21, %s71_s21 }
  0x10   :  { %32 = vadd.xlane.f32.xlu0 %v31_v2  ;;  %p106_p5 = scmp.ne.s32.totalorder %s71_s21, %s105_s22  ;;  %p111_p7 = scmp.lt.s32.totalorder %s105_s22, %s105_s22 }
  0x12   :  { %p112_p8 = por %p111_p7, %p110_p6 }
  0x14   :  { %p113_p9 = pnand %p112_p8, %p106_p5 }
  0x99   :  { %v33_v3 = vpop.xlane.xlu0 %32 }
  0x9a   :  { %v34_v4 = vmul.f32 0.00390625, %v33_v3 }
  0x9c   :  { %v35_v5 = vsub.f32 %v29_v0, %v34_v4  ;;  %v36_v6 = vsub.f32 %v30_v1, %v34_v4 }
  0x9e   :  { %v37_v7 = vmul.f32 %v35_v5, %v35_v5  ;;  %v38_v8 = vmul.f32 %v36_v6, %v36_v6 }
  0xa0   :  { %v39_v9 = vadd.f32 %v38_v8, %v37_v7 }
  0xa2   :  { %40 = vadd.xlane.f32.xlu0 %v39_v9 }
 0x12b   :  { %v41_v10 = vpop.xlane.xlu0 %40 }
 0x12c   :  { %v43_v11 = vmul.f32 0.003921569, %v41_v10 }
 0x12e   :  { %81 = vrsqrt.f32 %v43_v11  ;;  %vm46_vm0 = vcmp.eq.f32.partialorder %v43_v11, inf  ;;  %v49_v14 = vand.u32 2147483648, %v43_v11  ;;  %vm48_vm1 = vcmp.eq.f32.partialorder %v43_v11, 0.0 }
 0x13b   :  { %v82_v12 = vpop.eup %81 }
 0x13c   :  { %v45_v13 = vmul.f32 %v82_v12, %v43_v11 }
 0x13e   :  { %v47_v15 = vsel %vm46_vm0, %v43_v11, %v45_v13 }
 0x13f   :  { %v50_v16 = vsel %vm48_vm1, %v49_v14, %v47_v15 }
 0x140   :  { %v53_v17 = vadd.f32 1e-06, %v50_v16 }
 0x142   :  { %83 = vrcp.f32 %v53_v17 }
 0x14f   :  { %v84_v19 = vpop.eup %83 }
 0x150   :  { %v56_v20 = vmul.f32 %v84_v19, %v54_v18 }
 0x152   :  { %v57_v22 = vmul.f32 %v56_v20, %v35_v5  ;;  %v58_v23 = vmul.f32 %v56_v20, %v36_v6 }
 0x154   :  { %v60_v24 = vadd.f32 %v59_v21, %v57_v22  ;;  %v61_v25 = vadd.f32 %v59_v21, %v58_v23 }
 0x156   :  { %62 = vst [vmem:[#allocation7] sm:$0xff] %v60_v24  ;;  %63 = vst [vmem:[#allocation7 + $0x8] sm:$0xff] %v61_v25 }
 0x157   :  { %116 = shalt.err (!%p113_p9)
}
 0x158   :  { %73 = dma.vmem_to_hbm [thread:$0]  %s71_s21, 256, %s166_s3, [#allocation6]  }
 0x159   :  { %127 = dma.done.wait [#allocation6], 256  }
 0x15a   :  { %128 = vsyncadd [#allocation6], 4294967040 }
 0x15b   :  { %77 = vsyncpa [#allocation5], 1 }
 0x15c   :  { %78 = vsyncpa [#allocation6], 1 }

</bundles_post_ra>
